<compile_context>
chip_gen: v7x
topology: tpu7x:2x2x1
jax: 0.10.0
libtpu: 0.0.40
codegen_flags: <defaults>
</compile_context>

<pallas_src>
import jax
import jax.numpy as jnp
from jax import lax
from jax.experimental import pallas as pl
from jax.experimental.pallas import tpu as pltpu


def _feature_extractor_kernel(x_ref, w1_ref, b1_ref, w2_ref, b2_ref, out_ref):
    # x_ref  : (Kp, TILE_N)   bf16  im2col patches, pixels on the lane axis
    # w1_ref : (C1, Kp)       bf16  backbone 3x3 conv weights (transposed, K zero-padded)
    # b1_ref : (C1, 1)        f32
    # w2_ref : (C2, C1)       bf16  bottleneck 1x1 conv weights (transposed)
    # b2_ref : (C2, 1)        f32
    # out_ref: (C2, TILE_N)   f32   lane-dense output tile
    feat = jnp.dot(w1_ref[...], x_ref[...], preferred_element_type=jnp.float32)
    feat = jnp.maximum(feat + b1_ref[...], 0.0)                   # backbone ReLU (f32)
    bott = jnp.dot(w2_ref[...], feat.astype(w2_ref.dtype),
                   preferred_element_type=jnp.float32)
    out_ref[...] = jnp.maximum(bott + b2_ref[...], 0.0)           # bottleneck ReLU (f32)


def _pick_tile_n(n_cols):
    # biggest lane tile that still leaves >=2 grid steps (feeds both v7x TensorCores)
    divisors = [t for t in (2048, 1024, 512, 256, 128) if n_cols % t == 0]
    multi = [t for t in divisors if n_cols // t >= 2]
    return multi[0] if multi else divisors[0]


def feature_extractor(x_nchw, w1, b1, w2, b2, *, matmul_dtype=jnp.bfloat16):
    """x_nchw: (B, Cin, H, W).  Returns (B, bottleneck_size, H, W) (NCHW)."""
    B, Cin, H, W = x_nchw.shape
    C1 = w1.shape[-1]
    C2 = w2.shape[-1]
    K = 9 * Cin
    Kp = ((K + 15) // 16) * 16            # pad contraction dim to bf16 sublane pack

    # ---- wrapper-side im2col, channels-first (no NCHW<->NHWC transpose pass) ----
    xp = jnp.pad(x_nchw, ((0, 0), (0, 0), (1, 1), (1, 1)))        # (B, Cin, H+2, W+2)
    taps = [xp[:, :, dy:dy + H, dx:dx + W] for dy in range(3) for dx in range(3)]
    patches = jnp.concatenate(taps, axis=1)                       # (B, 9*Cin, H, W)
    # columns = (b, h, w) pixels; rows = (tap, cin) contraction
    x_cols = patches.reshape(B, K, H * W).transpose(1, 0, 2).reshape(K, B * H * W)

    n_cols = B * H * W
    n_pad = ((n_cols + 127) // 128) * 128                         # lane-dense column count
    x_cols = jnp.pad(x_cols, ((0, Kp - K), (0, n_pad - n_cols))).astype(matmul_dtype)

    # weights: (3,3,Cin,C1) -> (C1, Kp);  (C1,C2) -> (C2, C1);  biases -> column vectors
    w1_t = jnp.pad(w1.reshape(K, C1), ((0, Kp - K), (0, 0))).T.astype(matmul_dtype)
    w2_t = w2.T.astype(matmul_dtype)
    b1_c = b1.reshape(C1, 1).astype(jnp.float32)
    b2_c = b2.reshape(C2, 1).astype(jnp.float32)

    tile_n = _pick_tile_n(n_pad)
    grid = (n_pad // tile_n,)

    out_cols = pl.pallas_call(
        _feature_extractor_kernel,
        out_shape=jax.ShapeDtypeStruct((C2, n_pad), jnp.float32),
        grid_spec=pltpu.PrefetchScalarGridSpec(
            num_scalar_prefetch=0,
            grid=grid,
            in_specs=[
                pl.BlockSpec((Kp, tile_n), lambda j: (0, j)),
                pl.BlockSpec((C1, Kp), lambda j: (0, 0)),
                pl.BlockSpec((C1, 1), lambda j: (0, 0)),
                pl.BlockSpec((C2, C1), lambda j: (0, 0)),
                pl.BlockSpec((C2, 1), lambda j: (0, 0)),
            ],
            out_specs=pl.BlockSpec((C2, tile_n), lambda j: (0, j)),
        ),
        compiler_params=pltpu.CompilerParams(
            dimension_semantics=("parallel",)),
    )(x_cols, w1_t, b1_c, w2_t, b2_c)

    # (C2, B*H*W) -> (B, C2, H, W): pure reshape + batch/channel swap, already NCHW
    return out_cols[:, :n_cols].reshape(C2, B, H, W).transpose(1, 0, 2, 3)


def _reference(x_nchw, w1, b1, w2, b2):
    """Pure-JAX reference (lax.conv) for the correctness check."""
    y = lax.conv_general_dilated(
        x_nchw, w1, window_strides=(1, 1), padding="SAME",
        dimension_numbers=("NCHW", "HWIO", "NCHW"),
        precision=lax.Precision.HIGHEST)
    y = jnp.maximum(y + b1.reshape(1, -1, 1, 1), 0.0)
    z = jnp.einsum("bchw,cd->bdhw", y, w2, precision=lax.Precision.HIGHEST)
    z = jnp.maximum(z + b2.reshape(1, -1, 1, 1), 0.0)
    return z


if __name__ == "__main__":
    # Small shapes implied by the module: NCHW frame-like input,
    # original_size = backbone channels, bottleneck_size = reduced channels.
    B, Cin, H, W = 2, 4, 16, 16
    ORIGINAL_SIZE = 32     # lfd_params.model.original_size
    BOTTLENECK_SIZE = 8    # lfd_params.model.bottleneck_size

    key = jax.random.PRNGKey(0)
    kx, k1, k2, k3, k4 = jax.random.split(key, 5)

    x = jax.random.normal(kx, (B, Cin, H, W), dtype=jnp.float32)
    # deterministic synthetic parameters (no checkpoint load)
    w1 = jax.random.normal(k1, (3, 3, Cin, ORIGINAL_SIZE), dtype=jnp.float32) * 0.1
    b1 = jax.random.normal(k2, (1, ORIGINAL_SIZE), dtype=jnp.float32) * 0.1
    w2 = jax.random.normal(k3, (ORIGINAL_SIZE, BOTTLENECK_SIZE), dtype=jnp.float32) * 0.1
    b2 = jax.random.normal(k4, (1, BOTTLENECK_SIZE), dtype=jnp.float32) * 0.1

    out = jax.block_until_ready(feature_extractor(x, w1, b1, w2, b2))

    # reference uses bf16-rounded operands (kernel matmuls run bf16 x bf16 -> f32 acc)
    rnd = lambda a: a.astype(jnp.bfloat16).astype(jnp.float32)
    ref = _reference(rnd(x), rnd(w1), b1, rnd(w2), b2)

    assert out.shape == (B, BOTTLENECK_SIZE, H, W), out.shape
    max_err = jnp.max(jnp.abs(out - ref))
    assert jnp.allclose(out, ref, atol=1e-2, rtol=1e-2), f"max err {max_err}"

    # TODO(synk): the real backbone_class (e.g. TSM/I3D from lfd_params) is an external
    # pretrained network; it is synthesized here as a single 3x3 conv + ReLU extractor.
    print("KERNEL_OK")
</pallas_src>

<mosaic_0001>
module attributes {stable_mosaic.version = 11 : i64} {
  func.func @_feature_extractor_kernel(%arg0: i32, %arg1: memref<48x256xbf16, #tpu.memory_space<vmem>>, %arg2: memref<32x48xbf16, #tpu.memory_space<vmem>>, %arg3: memref<32x1xf32, #tpu.memory_space<vmem>>, %arg4: memref<8x32xbf16, #tpu.memory_space<vmem>>, %arg5: memref<8x1xf32, #tpu.memory_space<vmem>>, %arg6: memref<8x256xf32, #tpu.memory_space<vmem>>) attributes {dimension_semantics = [#tpu.dimension_semantics<parallel>], iteration_bounds = array<i64: 2>, scalar_prefetch = 0 : i64, scratch_operands = 0 : i64, tpu.core_type = #tpu.core_type<tc>, window_params = [{transform_indices = @transform_0, window_bounds = array<i64: 48, 256>}, {pipeline_mode = #tpu.pipeline_mode<synchronous>, transform_indices = @transform_1, window_bounds = array<i64: 32, 48>}, {pipeline_mode = #tpu.pipeline_mode<synchronous>, transform_indices = @transform_2, window_bounds = array<i64: 32, 1>}, {pipeline_mode = #tpu.pipeline_mode<synchronous>, transform_indices = @transform_3, window_bounds = array<i64: 8, 32>}, {pipeline_mode = #tpu.pipeline_mode<synchronous>, transform_indices = @transform_4, window_bounds = array<i64: 8, 1>}, {transform_indices = @transform_5, window_bounds = array<i64: 8, 256>}]} {
    %c0 = arith.constant 0 : index
    %c0_0 = arith.constant 0 : index
    %0 = vector.load %arg2[%c0, %c0_0] : memref<32x48xbf16, #tpu.memory_space<vmem>>, vector<32x48xbf16>
    %c0_1 = arith.constant 0 : index
    %c0_2 = arith.constant 0 : index
    %1 = vector.load %arg1[%c0_1, %c0_2] : memref<48x256xbf16, #tpu.memory_space<vmem>>, vector<48x256xbf16>
    %cst = arith.constant dense<0.000000e+00> : vector<32x256xf32>
    %2 = tpu.matmul %0, %1, %cst {dimension_numbers = #tpu.dot_dimension_numbers<[1], [0], [0], [1], [0, 0, 1, 1], [], []>} : vector<32x48xbf16>, vector<48x256xbf16>, vector<32x256xf32> -> vector<32x256xf32>
    %c0_3 = arith.constant 0 : index
    %c0_4 = arith.constant 0 : index
    %3 = vector.load %arg3[%c0_3, %c0_4] : memref<32x1xf32, #tpu.memory_space<vmem>>, vector<32x1xf32>
    %4 = vector.broadcast %3 : vector<32x1xf32> to vector<32x256xf32>
    %5 = arith.addf %2, %4 : vector<32x256xf32>
    %cst_5 = arith.constant 0.000000e+00 : f32
    %6 = vector.broadcast %cst_5 : f32 to vector<32x256xf32>
    %7 = arith.maximumf %5, %6 : vector<32x256xf32>
    %c0_6 = arith.constant 0 : index
    %c0_7 = arith.constant 0 : index
    %8 = vector.load %arg4[%c0_6, %c0_7] : memref<8x32xbf16, #tpu.memory_space<vmem>>, vector<8x32xbf16>
    %9 = arith.truncf %7 : vector<32x256xf32> to vector<32x256xbf16>
    %cst_8 = arith.constant dense<0.000000e+00> : vector<8x256xf32>
    %10 = tpu.matmul %8, %9, %cst_8 {dimension_numbers = #tpu.dot_dimension_numbers<[1], [0], [0], [1], [0, 0, 1, 1], [], []>} : vector<8x32xbf16>, vector<32x256xbf16>, vector<8x256xf32> -> vector<8x256xf32>
    %c0_9 = arith.constant 0 : index
    %c0_10 = arith.constant 0 : index
    %11 = vector.load %arg5[%c0_9, %c0_10] : memref<8x1xf32, #tpu.memory_space<vmem>>, vector<8x1xf32>
    %12 = vector.broadcast %11 : vector<8x1xf32> to vector<8x256xf32>
    %13 = arith.addf %10, %12 : vector<8x256xf32>
    %cst_11 = arith.constant 0.000000e+00 : f32
    %14 = vector.broadcast %cst_11 : f32 to vector<8x256xf32>
    %15 = arith.maximumf %13, %14 : vector<8x256xf32>
    %c0_12 = arith.constant 0 : index
    %c0_13 = arith.constant 0 : index
    %16 = vector.load %arg6[%c0_12, %c0_13] : memref<8x256xf32, #tpu.memory_space<vmem>>, vector<8x256xf32>
    tpu.vector_store %arg6[%c0_12, %c0_13], %15 {strides = array<i32>} : memref<8x256xf32, #tpu.memory_space<vmem>>, vector<8x256xf32>,
    return
  }
  func.func @transform_0(%arg0: i32) -> (i32, i32) {
    %c0_i32 = arith.constant 0 : i32
    %c0_i32_0 = arith.constant 0 : i32
    return %c0_i32, %arg0 : i32, i32
  }
  func.func @transform_1(%arg0: i32) -> (i32, i32) {
    %c0_i32 = arith.constant 0 : i32
    %c0_i32_0 = arith.constant 0 : i32
    %c0_i32_1 = arith.constant 0 : i32
    return %c0_i32, %c0_i32_0 : i32, i32
  }
  func.func @transform_2(%arg0: i32) -> (i32, i32) {
    %c0_i32 = arith.constant 0 : i32
    %c0_i32_0 = arith.constant 0 : i32
    %c0_i32_1 = arith.constant 0 : i32
    return %c0_i32, %c0_i32_0 : i32, i32
  }
  func.func @transform_3(%arg0: i32) -> (i32, i32) {
    %c0_i32 = arith.constant 0 : i32
    %c0_i32_0 = arith.constant 0 : i32
    %c0_i32_1 = arith.constant 0 : i32
    return %c0_i32, %c0_i32_0 : i32, i32
  }
  func.func @transform_4(%arg0: i32) -> (i32, i32) {
    %c0_i32 = arith.constant 0 : i32
    %c0_i32_0 = arith.constant 0 : i32
    %c0_i32_1 = arith.constant 0 : i32
    return %c0_i32, %c0_i32_0 : i32, i32
  }
  func.func @transform_5(%arg0: i32) -> (i32, i32) {
    %c0_i32 = arith.constant 0 : i32
    %c0_i32_0 = arith.constant 0 : i32
    return %c0_i32, %arg0 : i32, i32
  }
}

</mosaic_0001>

<bundles_post_ra>
// kernel: tpu_custom_call.1
= control target key start
LH: loop header
LB: loop body
LE: loop exit
PB: predicated region body
PF: predicated region fallthrough
CT: control target
= control target key end

     0   :  { %10 = vsyncpa [#allocation3], 0  ;;  %s938_s0 = inlined_call_operand.hbm [shape: bf16[48,512], index: 0, kind: input, shape index: {}]   ;;  %s939_s1 = inlined_call_operand.vmem [shape: bf16[32,48], index: 1, kind: input, shape index: {}]   ;;  %s940_s2 = inlined_call_operand.vmem [shape: f32[32,1], index: 2, kind: input, shape index: {}]   ;;  %s941_s3 = inlined_call_operand.vmem [shape: bf16[8,32], index: 3, kind: input, shape index: {}]   ;;  %s942_s4 = inlined_call_operand.vmem [shape: f32[8,1], index: 4, kind: input, shape index: {}]   ;;  %s943_s5 = inlined_call_operand.hbm [shape: f32[8,512], index: 5, kind: output, shape index: {}]  }
   0x1   :  { %12 = vsyncpa [#allocation3 + $0x1], 0 }
   0x2   :  { %13 = vsyncpa [#allocation4], 0 }
   0x3   :  { %15 = vsyncpa [#allocation4 + $0x1], 0  ;;  %s757_s18 = smov 0   ;;  %s759_s19 = smov 0  }
   0x4   :  { %s761_s20 = smov 0   ;;  %s763_s21 = smov 0  }
   0x5 LB: > { %s778_s22 = sadd.s32 4294967295, %s719_s21   ;;  %s533_s23 = sadd.s32 4294967294, %s719_s21   ;;  %s719_s21 = sphi %s763_s21, %s956_s21   ;;  %s715_s20 = sphi %s761_s20, %s955_s20   ;;  %s711_s19 = sphi %s759_s19, %s954_s19   ;;  %s707_s18 = sphi %s757_s18, %s953_s18  }
   0x6   : > { %s782_s24 = sadd.s32 1, %s719_s21   ;;  %s28_s25 = sadd.s32 1, %s715_s20 }
   0x7   : > { %s25_s26 = ssub.s32 %s719_s21, %s782_s24  ;;  %p35_p0 = scmp.ne.s32.totalorder %s715_s20, %s711_s19 }
   0x8   : > { %p26_p1 = scmp.eq.s32.totalorder %s25_s26, 0  ;;  %p36_p2 = scmp.eq.s32.totalorder %s719_s21, 0 }
   0x9   : > { %p41_p3 = scmp.ne.s32.totalorder %s711_s19, %s707_s18  ;;  %p42_p4 = scmp.eq.s32.totalorder %s778_s22, 0 }
   0xa   : > { %s794_s27 = scalar_select %p26_p1, %s715_s20, %s28_s25  }
   0xb   : > { %p37_p5 = por %p36_p2, %p35_p0  ;;  %p796_p6 = por %p42_p4, %p41_p3 }
   0xc   : > { %p149_p7 = scmp.eq.s32.totalorder %s778_s22, 1  ;;  %p155_p8 = scmp.eq.s32.totalorder %s533_s23, 1 }
   0xd   : > { %p572_p10 = scmp.lt.s32.totalorder %s719_s21, 2  ;;  %s187_s6 = sand.u32 1, %s715_s20  }
   0xe   : > { %p803_p11 = por %p149_p7, %p35_p0  ;;  %p807_p12 = por %p155_p8, %p41_p3 }
   0xf   : > { %s556_s7 = sshll.u32 %s719_s21, 7  ;;  %s558_s8 = smul.u32 48, %s187_s6 }
  0x10   : > { %s946_s29 = scalar_select %p803_p11, 1, 0 }
  0x11   : > { %s947_s30 = scalar_select %p807_p12, 1, 0 }
  0x12   : > { %s816_s11 = scalar_lea.hbm %s938_s0, %s556_s7  ;;  %p818_p13 = pnand %p572_p10, %p37_p5 }
  0x13   : > { %s191_s13 = scalar_lea.vmem [#allocation2], %s558_s8  ;;  %s825_s15 = scalar_lea.sflag [#allocation3], %s187_s6 }
  0x14   : > { %s198_s14 = sshll.u32 %s191_s13, 4  ;;  %s623_s16 = scalar_lea.hbm %s816_s11, 768  ;;  %s822_s14 = int_to_ptr.vmem [resolvable:$true] %s198_s14 }
  0x15   : > { %p624_p1 = scmp.ne.s32.totalorder %s816_s11, %s623_s16  ;;  %p625_p2 = pneg %p818_p13 }
  0x16   : > { %s628_s25 = scalar_lea.hbm %s938_s0, 1536  ;;  %p629_p5 = scmp.lt.u32.totalorder %s816_s11, %s938_s0 }
  0x17   : > { %p626_p3 = pnand %p625_p2, %p624_p1  ;;  %p630_p7 = scmp.lt.u32.totalorder %s628_s25, %s623_s16 }
  0x18   : > { %p632_p10 = scmp.lt.u32.totalorder %s623_s16, %s816_s11 }
  0x19   : > { %p627_p4 = pneg %p626_p3  ;;  %p631_p8 = por %p630_p7, %p629_p5 }
  0x1b   : > { %p633_p9 = por %p632_p10, %p631_p8 }
  0x1d   : > { %p634_p0 = pnand %p633_p9, %p627_p4 }
  0x1f   : > { %637 = shalt.err (!%p634_p0)
}
  0x20   : > { %s638_s6 = scalar_lea.vmem %s822_s14, 768  ;;  %s721_s8 = smov [#allocation2]  }
  0x21   : > { %p639_p1 = scmp.ne.s32.totalorder %s822_s14, %s638_s6  ;;  %s643_s9 = sshll.u32 %s721_s8, 4  ;;  %s644_s9 = int_to_ptr.vmem [resolvable:$false] %s643_s9 }
  0x22   : > { %s645_s10 = scalar_lea.vmem %s644_s9, 1536  ;;  %p646_p11 = scmp.lt.s32.totalorder %s822_s14, %s644_s9 }
  0x23   : > { %p641_p3 = pnand %p639_p1, %p625_p2  ;;  %p647_p5 = scmp.lt.s32.totalorder %s645_s10, %s638_s6 }
  0x25   : > { %p642_p12 = pneg %p641_p3  ;;  %p648_p7 = por %p647_p5, %p646_p11 }
  0x27   : > { %p649_p8 = pnand %p648_p7, %p642_p12 }
  0x29   : > { %652 = shalt.err (!%p649_p8)
}
  0x2a   : > { %s722_s13 = smov 256   ;;  %s723_s16 = smov 128  }
  0x2b   : > { %s724_s17 = smov 8   ;;  %p206_p9 = scmp.lt.s32.totalorder %s719_s21, 3 }
  0x2c   : > { %567 = dma.hbm_to_vmem [thread:$0]  (!%p818_p13), %s816_s11, 768, %s822_s14, %s825_s15, %s722_s13, %s723_s16, %s724_s17  }
  0x2d   : > { %p949_p0 = scmp.ge.s32.totalorder %s719_s21, 1 }
  0x2f   : > { %p207_p2 = pnand %p949_p0, %p206_p9 }
  0x30   : > { %s857_s23 = sand.u32 (!%p207_p2), 1, %s711_s19  }
  0x31   : > { %210 = sbr.rel (%p207_p2) target bundleno = 536 (0x218), region = 40  ;;  %s213_s26 = scalar_lea.sflag (!%p207_p2), [#allocation3], %s857_s23 }
  0x32   : > { %s559_s25 = smul.u32 (!%p207_p2), 48, %s857_s23 }
  0x34   : > { %s216_s7 = scalar_lea.vmem (!%p207_p2), [#allocation2], %s559_s25 }
  0x38   : > { %698 = dma.done.wait (%p796_p6), %s213_s26, 768  }
  0x39   : > { %700 = vsyncadd (%p796_p6), %s213_s26, 4294966528  ;;  %v725_v0 = vmov 0   ;;  %v612_v1 = vld [vmem:[%s216_s7 + $0x4] ss:$8 sps:$4 sm:$0xff]   ;;  %v614_v2 = vld [vmem:[%s216_s7] ss:$8 sps:$4 sm:$0xff]  }
  0x3a   : > { %359 = vmatprep.mubr.bf16.mxu0 %v725_v0  ;;  %610 = vset.pattern.permute.xlu0 %v725_v0  ;;  %v615_v3 = vld [vmem:[%s216_s7 + $0x14] ss:$8 sps:$4 sm:$0xff]   ;;  %v617_v4 = vld [vmem:[%s216_s7 + $0x10] ss:$8 sps:$4 sm:$0xff]   ;;  %v618_v5 = vld [vmem:[%s216_s7 + $0x24] ss:$8 sps:$4 sm:$0xff]  }
  0x3b   : > { %611 = vset.pattern.permute.xlu1 %v725_v0  ;;  %435 = vmatprep.mubr.bf16.mxu1 %v725_v0  ;;  %v256_v6 = vld [vmem:[%s940_s2] sm:$0xff]  ;;  %v258_v7 = vld [vmem:[%s940_s2 + $0x10] sm:$0xff]  ;;  %v257_v9 = vld [vmem:[%s940_s2 + $0x8] sm:$0xff]  ;;  %vm320_vm0 = vcmask 392192   ;;  %vm399_vm1 = vcmask 261120   ;;  %s539_s12 = sshll.u32 %s857_s23, 4 }
  0x3c   : > { %327 = vmatprep.subr.bf16.mxu0 %v612_v1  ;;  %v620_v8 = vld [vmem:[%s216_s7 + $0x20] ss:$8 sps:$4 sm:$0xff]   ;;  %262 = vperm.xlu0 %610, %v256_v6   ;;  %s557_s14 = sshll.u32 %s778_s22, 8  ;;  %s242_s28 = scalar_lea.vmem [#allocation5], %s539_s12 }
  0x3d   : > { %328 = vmatpush1.bf16.msra.mxu0 %v614_v2  ;;  %272 = vperm.xlu1 %611, %v258_v7   ;;  %v259_v10 = vld [vmem:[%s940_s2 + $0x18] sm:$0xff]  ;;  %v621_v11 = vld [vmem:[%s939_s1] sm:$0xff]   ;;  %v622_v13 = vld [vmem:[%s939_s1 + $0x8] sm:$0xff]   ;;  %s463_s15 = sshll.u32 %s242_s28, 4  ;;  %s894_s9 = scalar_lea.hbm %s943_s5, %s557_s14  ;;  %s896_s15 = int_to_ptr.vmem [resolvable:$true] %s463_s15 }
  0x3e   : > { %329 = vmatprep.subr.bf16.mxu0 %v615_v3  ;;  %v393_v12 = vld [vmem:[%s942_s4] sm:$0xff]  ;;  %s449_s22 = scalar_lea.sflag [#allocation4], %s857_s23  ;;  %s653_s10 = scalar_lea.vmem %s896_s15, 256 }
  0x3f   : > { %v388_v46 = vld [vmem:[%s941_s3] sm:$0xf]  ;;  %p654_p6 = scmp.ne.s32.totalorder %s896_s15, %s653_s10  ;;  %p950_p11 = scmp.ne.s32.totalorder %s946_s29, 0 }
  0x40   : > { %267 = vperm.xlu0 %610, %v257_v9   ;;  %s726_s13 = smov [#allocation5]  }
  0x41   : > { %330 = vmatpush1.bf16.msra.mxu0 %v617_v4  ;;  %277 = vperm.xlu1 %611, %v259_v10   ;;  %p655_p12 = pnand %p654_p6, %p950_p11  ;;  %s657_s16 = sshll.u32 %s726_s13, 4  ;;  %s658_s16 = int_to_ptr.vmem [resolvable:$false] %s657_s16 }
  0x42   : > { %331 = vmatprep.subr.bf16.mxu0 %v618_v5  ;;  %s659_s17 = scalar_lea.vmem %s658_s16, 512  ;;  %p660_p4 = scmp.lt.s32.totalorder %s896_s15, %s658_s16 }
  0x43   : > { %p656_p13 = pneg %p655_p12  ;;  %p661_p10 = scmp.lt.s32.totalorder %s659_s17, %s653_s10 }
  0x44   : > { %396 = vperm.xlu0 %610, %v393_v12  }
  0x45   : > { %332 = vmatpush1.bf16.msra.mxu0 %v620_v8  ;;  %p662_p1 = por %p661_p10, %p660_p4 }
  0x47   : > { %p663_p3 = pnand %p662_p1, %p656_p13 }
  0x48   : > { %548 = vmatmul.mubr.msk.bf16.vlgmr.msra.gmra.mrb[0].mxu0 %vm320_vm0, %v621_v11 }
  0x49   : > { %369 = vmatprep.mubr.bf16.mxu0 %v725_v0 }
  0x50   : > { %549 = vmatmul.mubr.msk.bf16.gmra.mrb[4].mxu0 %vm320_vm0, %v622_v13 }
  0xbb   : > { %v263_v14 = vpop.permute.xlu0 %262 }
  0xbc   : > { %v273_v23 = vpop.permute.xlu1 %272 }
  0xbf   : > { %v268_v18 = vpop.permute.xlu0 %267 }
  0xc0   : > { %v278_v34 = vpop.permute.xlu1 %277 }
  0xc3   : > { %v397_v47 = vpop.permute.xlu0 %396 }
 0x11b   : > { %v361_v15 = vpop.f32.mrb[0].mxu0 }
 0x11c   : > { %v362_v16 = vadd.f32 %v361_v15, %v263_v14  ;;  %v363_v17 = vpop.f32.mrb[1].mxu0 }
 0x11d   : > { %v364_v19 = vadd.f32 %v363_v17, %v263_v14  ;;  %v365_v20 = vpop.f32.mrb[2].mxu0 }
 0x11e   : > { %v366_v21 = vadd.f32 %v365_v20, %v268_v18  ;;  %v367_v22 = vpop.f32.mrb[3].mxu0  ;;  %v380_v25 = vmax.f32 %v362_v16, 0.0 }
 0x11f   : > { %v368_v24 = vadd.f32 %v367_v22, %v268_v18  ;;  %v381_v27 = vmax.f32 %v364_v19, 0.0 }
 0x120   : > { %v382_v26 = vmax.f32 %v366_v21, 0.0 }
 0x121   : > { %v383_v28 = vmax.f32 %v368_v24, 0.0 }
 0x122   : > { %v389_v29 = vpack.c.bf16 %v382_v26, %v380_v25 }
 0x123   : > { %v371_v30 = vpop.f32.mrb[4].mxu0  ;;  %v390_v31 = vpack.c.bf16 %v383_v28, %v381_v27 }
 0x124   : > { %v372_v32 = vadd.f32 %v371_v30, %v273_v23  ;;  %v373_v33 = vpop.f32.mrb[5].mxu0 }
 0x125   : > { %v374_v35 = vadd.f32 %v373_v33, %v273_v23  ;;  %v375_v36 = vpop.f32.mrb[6].mxu0  ;;  %403 = vmatprep.subr.bf16.mxu1 %v390_v31 }
 0x126   : > { %v376_v37 = vadd.f32 %v375_v36, %v278_v34  ;;  %v377_v38 = vpop.f32.mrb[7].mxu0  ;;  %404 = vmatpush1.bf16.msra.mxu1 %v389_v29  ;;  %v384_v40 = vmax.f32 %v372_v32, 0.0 }
 0x127   : > { %v378_v39 = vadd.f32 %v377_v38, %v278_v34  ;;  %v385_v42 = vmax.f32 %v374_v35, 0.0 }
 0x128   : > { %v386_v41 = vmax.f32 %v376_v37, 0.0 }
 0x129   : > { %v387_v43 = vmax.f32 %v378_v39, 0.0 }
 0x12a   : > { %v391_v44 = vpack.c.bf16 %v386_v41, %v384_v40 }
 0x12b   : > { %v392_v45 = vpack.c.bf16 %v387_v43, %v385_v42 }
 0x12d   : > { %405 = vmatprep.subr.bf16.mxu1 %v392_v45 }
 0x12e   : > { %406 = vmatpush1.bf16.msra.mxu1 %v391_v44 }
 0x131   : > { %550 = vmatmul.mubr.msk.bf16.vlgmr.msra.gmra.mrb[0].mxu1 %vm399_vm1, %v388_v46 }
 0x204   : > { %v437_v48 = vpop.f32.mrb[0].mxu1 }
 0x205   : > { %v438_v49 = vadd.f32 %v437_v48, %v397_v47  ;;  %v439_v50 = vpop.f32.mrb[1].mxu1 }
 0x206   : > { %v440_v51 = vadd.f32 %v439_v50, %v397_v47  ;;  %v441_v52 = vpop.f32.mrb[2].mxu1 }
 0x207   : > { %v444_v53 = vmax.f32 %v438_v49, 0.0  ;;  %v442_v54 = vpop.f32.mrb[3].mxu1 }
 0x208   : > { %v445_v55 = vmax.f32 %v440_v51, 0.0 }
 0x209   : > { %446 = vst [vmem:[%s242_s28] sm:$0xff] %v444_v53 }
 0x20a   : > { %447 = vst [vmem:[%s242_s28 + $0x8] sm:$0xff] %v445_v55 }
 0x20b   : > { %666 = shalt.err (!%p663_p3)
}
 0x20c   : > { %s667_s23 = scalar_lea.hbm %s894_s9, 256  ;;  %s671_s7 = scalar_lea.hbm %s943_s5, 512 }
 0x20d   : > { %p668_p5 = scmp.ne.s32.totalorder %s894_s9, %s667_s23  ;;  %p672_p9 = scmp.lt.u32.totalorder %s894_s9, %s943_s5 }
 0x20e   : > { %p673_p0 = scmp.lt.u32.totalorder %s671_s7, %s667_s23  ;;  %p675_p6 = scmp.lt.u32.totalorder %s667_s23, %s894_s9 }
 0x20f   : > { %p669_p7 = pnand %p668_p5, %p950_p11 }
 0x210   : > { %p674_p2 = por %p673_p0, %p672_p9 }
 0x211   : > { %p670_p8 = pneg %p669_p7 }
 0x212   : > { %p676_p12 = por %p675_p6, %p674_p2 }
 0x214   : > { %p677_p13 = pnand %p676_p12, %p670_p8 }
 0x216   : > { %680 = shalt.err (!%p677_p13)
}
 0x217   : > { %562 = dma.vmem_to_hbm [thread:$0]  (%p950_p11), %s896_s15, 256, %s894_s9, %s449_s22  }
 0x218 PF: > { %s475_s14 = sand.u32 1, %s707_s18   ;;  %p951_p4 = scmp.ne.s32.totalorder %s947_s30, 0 }
 0x219   : > { %p952_p10 = scmp.ge.s32.totalorder %s719_s21, 2  ;;  %s476_s28 = scalar_lea.sflag [#allocation4], %s475_s14 }
 0x21b   : > { %p569_p1 = pnand %p952_p10, %p951_p4 }
 0x21d   : > { %702 = dma.done.wait (!%p569_p1), %s476_s28, 256  }
 0x21e   : > { %704 = vsyncadd (!%p569_p1), %s476_s28, 4294967040  ;;  %p18_p3 = scmp.ge.s32.totalorder %s782_s24, 4   ;;  %s953_s18 = smov %s711_s19 }
 0x21f   : > { %s954_s19 = smov %s715_s20  ;;  %s955_s20 = smov %s794_s27 }
 0x220   : > { %s956_s21 = smov %s782_s24  ;;  %20 = sbr.rel (!%p18_p3) target bundleno = 5 (0x5), region = 85 }
 0x227   :  { %481 = vsyncpa [#allocation3], 1 }
 0x228   :  { %483 = vsyncpa [#allocation3 + $0x1], 1 }
 0x229   :  { %484 = vsyncpa [#allocation4], 1 }
 0x22a   :  { %486 = vsyncpa [#allocation4 + $0x1], 1 }

</bundles_post_ra>
